<compile_context>
chip_gen: v6e
topology: v6e:2x2x1
jax: 0.10.0
libtpu: 0.0.40
codegen_flags: <defaults>
</compile_context>

<pallas_src>
import functools

import jax
import jax.numpy as jnp
from jax import lax
from jax.experimental import pallas as pl
from jax.experimental.pallas import tpu as pltpu


def _dwsep_kernel(xflat_ref, wfold_ref, o_ref, *, K, dil, Wp, Lout):
    """Fused depthwise + pointwise conv for one image.

    xflat_ref: (C, Hp*Wp + tail)  padded image, rows flattened onto lanes
    wfold_ref: (K*K, O, C)        folded weights  pw[o,c] * dw[c,kh,kw]
    o_ref:     (O, Ho*Wp)         lane-dense flat output (width still padded;
                                  wrapper discards the last Wp-Wo columns)
    """
    w_all = wfold_ref[...]                          # (K*K, O, C), tiny
    acc = jnp.zeros(o_ref.shape, jnp.float32)       # (O, Ho*Wp) f32 accumulator
    for kh in range(K):
        for kw in range(K):
            off = dil * (kh * Wp + kw)              # static lane offset
            x_k = xflat_ref[:, off:off + Lout]      # (C, Ho*Wp) shifted window
            w_k = w_all[kh * K + kw]                # (O, C)
            acc = acc + jnp.dot(w_k, x_k,
                                preferred_element_type=jnp.float32)  # MXU
    o_ref[...] = acc.astype(o_ref.dtype)


def conv2d_depthwise_separable(x_nchw, dw_w, pw_w, *, padding=0, dilation=1):
    """x_nchw: (N, C, H, W) float32
    dw_w: (C, 1, K, K)  -- torch depthwise Conv2d weight (groups=C)
    pw_w: (O, C, 1, 1)  -- torch pointwise Conv2d weight
    returns (N, O, Ho, Wo) float32.  stride == 1 (as in the module).
    """
    N, C, H, W = x_nchw.shape
    K = dw_w.shape[-1]
    O = pw_w.shape[0]

    Hp, Wp = H + 2 * padding, W + 2 * padding
    Ho = Hp - dilation * (K - 1)
    Wo = Wp - dilation * (K - 1)
    assert Ho > 0 and Wo > 0, "kernel/dilation too large for input"

    # Pad spatially, flatten rows onto the lane axis, add a small tail pad so
    # every shifted window slice stays in-bounds (garbage columns are dropped).
    tail = dilation * (K - 1)
    xpad = jnp.pad(x_nchw, ((0, 0), (0, 0),
                            (padding, padding), (padding, padding)))
    xflat = xpad.reshape(N, C, Hp * Wp)
    xflat = jnp.pad(xflat, ((0, 0), (0, 0), (0, tail)))
    Lin = Hp * Wp + tail
    Lout = Ho * Wp

    # Fold the two weight tensors: wfold[kh*K+kw, o, c] = pw[o,c] * dw[c,kh,kw]
    dw = dw_w[:, 0, :, :]                                    # (C, K, K)
    pw = pw_w[:, :, 0, 0]                                    # (O, C)
    wfold = pw[None, :, :] * jnp.transpose(dw, (1, 2, 0)).reshape(K * K, 1, C)

    kernel = functools.partial(_dwsep_kernel, K=K, dil=dilation, Wp=Wp,
                               Lout=Lout)

    out_flat = pl.pallas_call(
        kernel,
        out_shape=jax.ShapeDtypeStruct((N, O, Lout), x_nchw.dtype),
        grid=(N,),
        in_specs=[
            pl.BlockSpec((None, C, Lin), lambda n: (n, 0, 0)),
            pl.BlockSpec((K * K, O, C), lambda n: (0, 0, 0)),
        ],
        out_specs=pl.BlockSpec((None, O, Lout), lambda n: (n, 0, 0)),
        compiler_params=pltpu.CompilerParams(
            dimension_semantics=("parallel",)),
    )(xflat, wfold)

    # Drop the padded-width wrap columns; pure layout plumbing in XLA.
    out = out_flat.reshape(N, O, Ho, Wp)[:, :, :, :Wo]
    return out


def _reference(x_nchw, dw_w, pw_w, *, padding, dilation):
    """Pure-JAX reference matching torch semantics."""
    y = lax.conv_general_dilated(
        x_nchw, dw_w, window_strides=(1, 1),
        padding=[(padding, padding), (padding, padding)],
        rhs_dilation=(dilation, dilation),
        dimension_numbers=("NCHW", "OIHW", "NCHW"),
        feature_group_count=x_nchw.shape[1])
    z = lax.conv_general_dilated(
        y, pw_w, window_strides=(1, 1), padding="VALID",
        dimension_numbers=("NCHW", "OIHW", "NCHW"))
    return z


if __name__ == "__main__":
    # Module config: Conv2d_DepthWiseSeperable(inC=4, outC=8, ksize=3,
    #                                          padding=1, dilation=1)
    N, inC, outC, K = 2, 4, 8, 3
    H = W = 16
    padding, dilation = 1, 1

    key = jax.random.PRNGKey(0)
    kx, kdw, kpw = jax.random.split(key, 3)

    x = jax.random.normal(kx, (N, inC, H, W), dtype=jnp.float32)
    dw_w = jax.random.normal(kdw, (inC, 1, K, K), dtype=jnp.float32) * 0.1
    pw_w = jax.random.normal(kpw, (outC, inC, 1, 1), dtype=jnp.float32) * 0.1

    out = conv2d_depthwise_separable(x, dw_w, pw_w,
                                     padding=padding, dilation=dilation)
    out = jax.block_until_ready(out)

    ref = _reference(x, dw_w, pw_w, padding=padding, dilation=dilation)
    assert out.shape == ref.shape, (out.shape, ref.shape)
    assert jnp.allclose(out, ref, atol=1e-5, rtol=1e-5), \
        float(jnp.max(jnp.abs(out - ref)))

    print("KERNEL_OK")
</pallas_src>

<mosaic_0001>
module attributes {stable_mosaic.version = 11 : i64} {
  func.func @_dwsep_kernel(%arg0: i32, %arg1: memref<1x4x326xf32, #tpu.memory_space<vmem>>, %arg2: memref<9x8x4xf32, #tpu.memory_space<vmem>>, %arg3: memref<1x8x288xf32, #tpu.memory_space<vmem>>) attributes {dimension_semantics = [#tpu.dimension_semantics<parallel>], iteration_bounds = array<i64: 2>, scalar_prefetch = 0 : i64, scratch_operands = 0 : i64, tpu.core_type = #tpu.core_type<tc>, window_params = [{transform_indices = @transform_0, window_bounds = array<i64: 1, 4, 326>}, {pipeline_mode = #tpu.pipeline_mode<synchronous>, transform_indices = @transform_1, window_bounds = array<i64: 9, 8, 4>}, {transform_indices = @transform_2, window_bounds = array<i64: 1, 8, 288>}]} {
    %c0 = arith.constant 0 : index
    %c0_0 = arith.constant 0 : index
    %c0_1 = arith.constant 0 : index
    %0 = vector.load %arg2[%c0, %c0_0, %c0_1] : memref<9x8x4xf32, #tpu.memory_space<vmem>>, vector<9x8x4xf32>
    %cst = arith.constant 0.000000e+00 : f32
    %1 = vector.broadcast %cst : f32 to vector<8x288xf32>
    %c0_2 = arith.constant 0 : index
    %c0_3 = arith.constant 0 : index
    %c0_4 = arith.constant 0 : index
    %2 = vector.load %arg1[%c0_2, %c0_3, %c0_4] : memref<1x4x326xf32, #tpu.memory_space<vmem>>, vector<1x4x288xf32>
    %3 = vector.shape_cast %2 : vector<1x4x288xf32> to vector<4x288xf32>
    %4 = vector.extract_strided_slice %0 {offsets = [0, 0, 0], sizes = [1, 8, 4], strides = [1, 1, 1]} : vector<9x8x4xf32> to vector<1x8x4xf32>
    %5 = vector.shape_cast %4 : vector<1x8x4xf32> to vector<8x4xf32>
    %cst_5 = arith.constant dense<0.000000e+00> : vector<8x288xf32>
    %6 = tpu.matmul %5, %3, %cst_5 {dimension_numbers = #tpu.dot_dimension_numbers<[1], [0], [0], [1], [0, 0, 1, 1], [], []>} : vector<8x4xf32>, vector<4x288xf32>, vector<8x288xf32> -> vector<8x288xf32>
    %7 = arith.addf %1, %6 : vector<8x288xf32>
    %c0_6 = arith.constant 0 : index
    %c0_7 = arith.constant 0 : index
    %c1 = arith.constant 1 : index
    %8 = vector.load %arg1[%c0_6, %c0_7, %c1] : memref<1x4x326xf32, #tpu.memory_space<vmem>>, vector<1x4x288xf32>
    %9 = vector.shape_cast %8 : vector<1x4x288xf32> to vector<4x288xf32>
    %10 = vector.extract_strided_slice %0 {offsets = [1, 0, 0], sizes = [1, 8, 4], strides = [1, 1, 1]} : vector<9x8x4xf32> to vector<1x8x4xf32>
    %11 = vector.shape_cast %10 : vector<1x8x4xf32> to vector<8x4xf32>
    %cst_8 = arith.constant dense<0.000000e+00> : vector<8x288xf32>
    %12 = tpu.matmul %11, %9, %cst_8 {dimension_numbers = #tpu.dot_dimension_numbers<[1], [0], [0], [1], [0, 0, 1, 1], [], []>} : vector<8x4xf32>, vector<4x288xf32>, vector<8x288xf32> -> vector<8x288xf32>
    %13 = arith.addf %7, %12 : vector<8x288xf32>
    %c0_9 = arith.constant 0 : index
    %c0_10 = arith.constant 0 : index
    %c2 = arith.constant 2 : index
    %14 = vector.load %arg1[%c0_9, %c0_10, %c2] : memref<1x4x326xf32, #tpu.memory_space<vmem>>, vector<1x4x288xf32>
    %15 = vector.shape_cast %14 : vector<1x4x288xf32> to vector<4x288xf32>
    %16 = vector.extract_strided_slice %0 {offsets = [2, 0, 0], sizes = [1, 8, 4], strides = [1, 1, 1]} : vector<9x8x4xf32> to vector<1x8x4xf32>
    %17 = vector.shape_cast %16 : vector<1x8x4xf32> to vector<8x4xf32>
    %cst_11 = arith.constant dense<0.000000e+00> : vector<8x288xf32>
    %18 = tpu.matmul %17, %15, %cst_11 {dimension_numbers = #tpu.dot_dimension_numbers<[1], [0], [0], [1], [0, 0, 1, 1], [], []>} : vector<8x4xf32>, vector<4x288xf32>, vector<8x288xf32> -> vector<8x288xf32>
    %19 = arith.addf %13, %18 : vector<8x288xf32>
    %c0_12 = arith.constant 0 : index
    %c0_13 = arith.constant 0 : index
    %c18 = arith.constant 18 : index
    %20 = vector.load %arg1[%c0_12, %c0_13, %c18] : memref<1x4x326xf32, #tpu.memory_space<vmem>>, vector<1x4x288xf32>
    %21 = vector.shape_cast %20 : vector<1x4x288xf32> to vector<4x288xf32>
    %22 = vector.extract_strided_slice %0 {offsets = [3, 0, 0], sizes = [1, 8, 4], strides = [1, 1, 1]} : vector<9x8x4xf32> to vector<1x8x4xf32>
    %23 = vector.shape_cast %22 : vector<1x8x4xf32> to vector<8x4xf32>
    %cst_14 = arith.constant dense<0.000000e+00> : vector<8x288xf32>
    %24 = tpu.matmul %23, %21, %cst_14 {dimension_numbers = #tpu.dot_dimension_numbers<[1], [0], [0], [1], [0, 0, 1, 1], [], []>} : vector<8x4xf32>, vector<4x288xf32>, vector<8x288xf32> -> vector<8x288xf32>
    %25 = arith.addf %19, %24 : vector<8x288xf32>
    %c0_15 = arith.constant 0 : index
    %c0_16 = arith.constant 0 : index
    %c19 = arith.constant 19 : index
    %26 = vector.load %arg1[%c0_15, %c0_16, %c19] : memref<1x4x326xf32, #tpu.memory_space<vmem>>, vector<1x4x288xf32>
    %27 = vector.shape_cast %26 : vector<1x4x288xf32> to vector<4x288xf32>
    %28 = vector.extract_strided_slice %0 {offsets = [4, 0, 0], sizes = [1, 8, 4], strides = [1, 1, 1]} : vector<9x8x4xf32> to vector<1x8x4xf32>
    %29 = vector.shape_cast %28 : vector<1x8x4xf32> to vector<8x4xf32>
    %cst_17 = arith.constant dense<0.000000e+00> : vector<8x288xf32>
    %30 = tpu.matmul %29, %27, %cst_17 {dimension_numbers = #tpu.dot_dimension_numbers<[1], [0], [0], [1], [0, 0, 1, 1], [], []>} : vector<8x4xf32>, vector<4x288xf32>, vector<8x288xf32> -> vector<8x288xf32>
    %31 = arith.addf %25, %30 : vector<8x288xf32>
    %c0_18 = arith.constant 0 : index
    %c0_19 = arith.constant 0 : index
    %c20 = arith.constant 20 : index
    %32 = vector.load %arg1[%c0_18, %c0_19, %c20] : memref<1x4x326xf32, #tpu.memory_space<vmem>>, vector<1x4x288xf32>
    %33 = vector.shape_cast %32 : vector<1x4x288xf32> to vector<4x288xf32>
    %34 = vector.extract_strided_slice %0 {offsets = [5, 0, 0], sizes = [1, 8, 4], strides = [1, 1, 1]} : vector<9x8x4xf32> to vector<1x8x4xf32>
    %35 = vector.shape_cast %34 : vector<1x8x4xf32> to vector<8x4xf32>
    %cst_20 = arith.constant dense<0.000000e+00> : vector<8x288xf32>
    %36 = tpu.matmul %35, %33, %cst_20 {dimension_numbers = #tpu.dot_dimension_numbers<[1], [0], [0], [1], [0, 0, 1, 1], [], []>} : vector<8x4xf32>, vector<4x288xf32>, vector<8x288xf32> -> vector<8x288xf32>
    %37 = arith.addf %31, %36 : vector<8x288xf32>
    %c0_21 = arith.constant 0 : index
    %c0_22 = arith.constant 0 : index
    %c36 = arith.constant 36 : index
    %38 = vector.load %arg1[%c0_21, %c0_22, %c36] : memref<1x4x326xf32, #tpu.memory_space<vmem>>, vector<1x4x288xf32>
    %39 = vector.shape_cast %38 : vector<1x4x288xf32> to vector<4x288xf32>
    %40 = vector.extract_strided_slice %0 {offsets = [6, 0, 0], sizes = [1, 8, 4], strides = [1, 1, 1]} : vector<9x8x4xf32> to vector<1x8x4xf32>
    %41 = vector.shape_cast %40 : vector<1x8x4xf32> to vector<8x4xf32>
    %cst_23 = arith.constant dense<0.000000e+00> : vector<8x288xf32>
    %42 = tpu.matmul %41, %39, %cst_23 {dimension_numbers = #tpu.dot_dimension_numbers<[1], [0], [0], [1], [0, 0, 1, 1], [], []>} : vector<8x4xf32>, vector<4x288xf32>, vector<8x288xf32> -> vector<8x288xf32>
    %43 = arith.addf %37, %42 : vector<8x288xf32>
    %c0_24 = arith.constant 0 : index
    %c0_25 = arith.constant 0 : index
    %c37 = arith.constant 37 : index
    %44 = vector.load %arg1[%c0_24, %c0_25, %c37] : memref<1x4x326xf32, #tpu.memory_space<vmem>>, vector<1x4x288xf32>
    %45 = vector.shape_cast %44 : vector<1x4x288xf32> to vector<4x288xf32>
    %46 = vector.extract_strided_slice %0 {offsets = [7, 0, 0], sizes = [1, 8, 4], strides = [1, 1, 1]} : vector<9x8x4xf32> to vector<1x8x4xf32>
    %47 = vector.shape_cast %46 : vector<1x8x4xf32> to vector<8x4xf32>
    %cst_26 = arith.constant dense<0.000000e+00> : vector<8x288xf32>
    %48 = tpu.matmul %47, %45, %cst_26 {dimension_numbers = #tpu.dot_dimension_numbers<[1], [0], [0], [1], [0, 0, 1, 1], [], []>} : vector<8x4xf32>, vector<4x288xf32>, vector<8x288xf32> -> vector<8x288xf32>
    %49 = arith.addf %43, %48 : vector<8x288xf32>
    %c0_27 = arith.constant 0 : index
    %c0_28 = arith.constant 0 : index
    %c38 = arith.constant 38 : index
    %50 = vector.load %arg1[%c0_27, %c0_28, %c38] : memref<1x4x326xf32, #tpu.memory_space<vmem>>, vector<1x4x288xf32>
    %51 = vector.shape_cast %50 : vector<1x4x288xf32> to vector<4x288xf32>
    %52 = vector.extract_strided_slice %0 {offsets = [8, 0, 0], sizes = [1, 8, 4], strides = [1, 1, 1]} : vector<9x8x4xf32> to vector<1x8x4xf32>
    %53 = vector.shape_cast %52 : vector<1x8x4xf32> to vector<8x4xf32>
    %cst_29 = arith.constant dense<0.000000e+00> : vector<8x288xf32>
    %54 = tpu.matmul %53, %51, %cst_29 {dimension_numbers = #tpu.dot_dimension_numbers<[1], [0], [0], [1], [0, 0, 1, 1], [], []>} : vector<8x4xf32>, vector<4x288xf32>, vector<8x288xf32> -> vector<8x288xf32>
    %55 = arith.addf %49, %54 : vector<8x288xf32>
    %c0_30 = arith.constant 0 : index
    %c0_31 = arith.constant 0 : index
    %c0_32 = arith.constant 0 : index
    %56 = vector.load %arg3[%c0_30, %c0_31, %c0_32] : memref<1x8x288xf32, #tpu.memory_space<vmem>>, vector<1x8x288xf32>
    %57 = vector.shape_cast %56 : vector<1x8x288xf32> to vector<8x288xf32>
    %58 = vector.shape_cast %55 : vector<8x288xf32> to vector<1x8x288xf32>
    tpu.vector_store %arg3[%c0_30, %c0_31, %c0_32], %58 {strides = array<i32>} : memref<1x8x288xf32, #tpu.memory_space<vmem>>, vector<1x8x288xf32>,
    return
  }
  func.func @transform_0(%arg0: i32) -> (i32, i32, i32) {
    %c0_i32 = arith.constant 0 : i32
    %c0_i32_0 = arith.constant 0 : i32
    %c0_i32_1 = arith.constant 0 : i32
    return %arg0, %c0_i32, %c0_i32_0 : i32, i32, i32
  }
  func.func @transform_1(%arg0: i32) -> (i32, i32, i32) {
    %c0_i32 = arith.constant 0 : i32
    %c0_i32_0 = arith.constant 0 : i32
    %c0_i32_1 = arith.constant 0 : i32
    %c0_i32_2 = arith.constant 0 : i32
    return %c0_i32, %c0_i32_0, %c0_i32_1 : i32, i32, i32
  }
  func.func @transform_2(%arg0: i32) -> (i32, i32, i32) {
    %c0_i32 = arith.constant 0 : i32
    %c0_i32_0 = arith.constant 0 : i32
    %c0_i32_1 = arith.constant 0 : i32
    return %arg0, %c0_i32, %c0_i32_0 : i32, i32, i32
  }
}

</mosaic_0001>

<bundles_post_ra>
// kernel: tpu_custom_call.1
= control target key start
LH: loop header
LB: loop body
LE: loop exit
PB: predicated region body
PF: predicated region fallthrough
CT: control target
= control target key end

     0   :  { %7 = vsyncpa [#allocation3], 0  ;;  %s2211_s0 = inlined_call_operand.vmem [shape: f32[2,4,326], index: 0, kind: input, shape index: {}]   ;;  %s2212_s1 = inlined_call_operand.vmem [shape: f32[9,8,4], index: 1, kind: input, shape index: {}]   ;;  %s2213_s2 = inlined_call_operand.hbm [shape: f32[2,8,288], index: 2, kind: output, shape index: {}]  }
   0x1   :  { %9 = vsyncpa [#allocation3 + $0x1], 0  ;;  %s1971_s9 = smov 0   ;;  %s1973_s10 = smov 0  }
   0x2   :  { %s1975_s11 = smov 0   ;;  %s1977_s12 = smov 0  }
   0x3 LB: > { %s1992_s13 = sadd.s32 4294967295, %s1943_s12   ;;  %s1714_s14 = sadd.s32 4294967294, %s1943_s12   ;;  %s1943_s12 = sphi %s1977_s12, %s2219_s12   ;;  %s1939_s11 = sphi %s1975_s11, %s2218_s11   ;;  %s1935_s10 = sphi %s1973_s10, %s2217_s10   ;;  %s1931_s9 = sphi %s1971_s9, %s2216_s9  }
   0x4   : > { %s1996_s15 = sadd.s32 1, %s1943_s12   ;;  %s69_s16 = sadd.s32 1, %s1939_s11 }
   0x5   : > { %s66_s17 = ssub.s32 %s1943_s12, %s1996_s15  ;;  %p79_p0 = scmp.ne.s32.totalorder %s1939_s11, %s1935_s10 }
   0x6   : > { %p67_p1 = scmp.eq.s32.totalorder %s66_s17, 0  ;;  %p80_p2 = scmp.eq.s32.totalorder %s1992_s13, 1 }
   0x7   : > { %p85_p3 = scmp.ne.s32.totalorder %s1935_s10, %s1931_s9  ;;  %p86_p4 = scmp.eq.s32.totalorder %s1714_s14, 1 }
   0x8   : > { %s2007_s18 = scalar_select %p67_p1, %s1939_s11, %s69_s16  }
   0x9   : > { %p2009_p5 = por %p80_p2, %p79_p0  ;;  %p2013_p6 = por %p86_p4, %p85_p3 }
   0xa   : > { %p1717_p7 = scmp.ge.s32.totalorder %s1943_s12, 1  ;;  %p115_p8 = scmp.lt.s32.totalorder %s1943_s12, 3 }
   0xc   : > { %p116_p9 = pnand %p1717_p7, %p115_p8 }
   0xd   : > { %p137_p10 = scmp.lt.s32.totalorder (!%p116_p9), %s1992_s13, 1  ;;  %s1947_s26 = smov (!%p116_p9), 127  }
   0xe   : > { %119 = sbr.rel (%p116_p9) target bundleno = 397 (0x18d), region = 28  ;;  %s1948_s27 = smov (!%p116_p9), 126  }
   0xf   : > { %s1949_s28 = smov (!%p116_p9), 110   ;;  %s1950_s29 = smov (!%p116_p9), 109  }
  0x10   : > { %s1951_s30 = smov (!%p116_p9), 108   ;;  %s1952_s3 = smov (!%p116_p9), 92  }
  0x11   : > { %s1953_s4 = smov (!%p116_p9), 91   ;;  %s1954_s5 = smov (!%p116_p9), 90  }
  0x12   : > { %s1832_s7 = smul.u32 (!%p116_p9), 384, %s1992_s13  ;;  %s1955_s23 = smov (!%p116_p9), [#allocation2]  }
  0x13   : > { %v1945_v0 = vmov 0.0   ;;  %vm1946_vm0 = vmmov 0   ;;  %s138_s21 = scalar_select %p137_p10, %s1992_s13, 1  ;;  %vm169_vm1 = vcmask 1043456   ;;  %v143_v11 = vld [vmem:[%s2212_s1 + $0x8] sm:$0xff]  ;;  %vm165_vm2 = vcmask 31744  }
  0x14   : > { %1785 = vmatprep.subr.mxu1 %v1945_v0  ;;  %1787 = vmatprep.mubr.msk.f32.mxu1 %vm1946_vm0, %v1945_v0  ;;  %v142_v14 = vld [vmem:[%s2212_s1] sm:$0xff]  ;;  %vm162_vm3 = vcmask 1039360   ;;  %v144_v17 = vld [vmem:[%s2212_s1 + $0x10] sm:$0xff]  ;;  %vm478_vm4 = vcmask 1031168   ;;  %v145_v24 = vld [vmem:[%s2212_s1 + $0x18] sm:$0xff]  ;;  %vm645_vm5 = vcmask 900096  }
  0x15   : > { %240 = vmatprep.mubr.f32.mxu0 %v1945_v0  ;;  %s1831_s22 = smul.u32 12, %s138_s21  ;;  %vm812_vm6 = vcmask 891904   ;;  %v146_v33 = vld [vmem:[%s2212_s1 + $0x20] sm:$0xff]  ;;  %vm979_vm7 = vcmask 883712   ;;  %v147_v38 = vld [vmem:[%s2212_s1 + $0x28] sm:$0xff]  ;;  %vm1146_vm8 = vcmask 752640   ;;  %s1653_s21 = scalar_lea.hbm %s2213_s2, %s1832_s7 }
  0x16   : > { %v148_v43 = vld [vmem:[%s2212_s1 + $0x30] sm:$0xff]  ;;  %vm1313_vm9 = vcmask 744448   ;;  %v149_v48 = vld [vmem:[%s2212_s1 + $0x38] sm:$0xff]  ;;  %vm1480_vm10 = vcmask 736256   ;;  %v150_v55 = vld [vmem:[%s2212_s1 + $0x40] sm:$0xff]  ;;  %vm1638_vm11 = vcmask 261120  }
  0x17   : > { %s2028_s25 = scalar_lea.vmem %s2211_s0, %s1831_s22  ;;  %s1887_s24 = sshll.u32 %s1955_s23, 4  ;;  %s1888_s24 = int_to_ptr.vmem [resolvable:$false] %s1887_s24 }
  0x18   : > { %v152_v1 = vld [vmem:[%s2028_s25 + $0x8] sm:$0xf]  ;;  %v2032_v2 = vld [vmem:[%s2028_s25] sm:$0xff] }
  0x19   : > { %160 = vrot.lane.b32.xlu0 %v152_v1, %s1947_s26  ;;  %156 = vrot.lane.b32.xlu1 %v2032_v2, %s1947_s26  ;;  %v468_v3 = vld [vmem:[%s2028_s25 + $0x8] sm:$0xf]  ;;  %v2038_v4 = vcombine.high %v2032_v2, %v2032_v2 }
  0x1a   : > { %v635_v5 = vld [vmem:[%s2028_s25 + $0x8] sm:$0xf] }
  0x1b   : > { %v802_v6 = vld [vmem:[%s2028_s25 + $0x8] sm:$0xf] }
  0x1c   : > { %v969_v7 = vld [vmem:[%s2028_s25 + $0x8] sm:$0xf] }
  0x1d   : > { %476 = vrot.lane.b32.xlu0 %v468_v3, %s1948_s27  ;;  %472 = vrot.lane.b32.xlu1 %v2032_v2, %s1948_s27  ;;  %v1136_v8 = vld [vmem:[%s2028_s25 + $0x8] sm:$0xf] }
  0x1e   : > { %v1303_v9 = vld [vmem:[%s2028_s25 + $0x8] sm:$0xf] }
  0x1f   : > { %v1470_v10 = vld [vmem:[%s2028_s25 + $0x8] sm:$0xf]  ;;  %s1889_s25 = scalar_lea.vmem %s1888_s24, 768 }
  0x21   : > { %474 = vrot.lane.b32.xlu1 %v2038_v4, %s1948_s27  ;;  %158 = vrot.lane.b32.xlu0 %v2038_v4, %s1947_s26 }
  0x25   : > { %643 = vrot.lane.b32.xlu1 %v635_v5, %s1949_s28  ;;  %641 = vrot.lane.b32.xlu0 %v2038_v4, %s1949_s28 }
  0x29   : > { %808 = vrot.lane.b32.xlu1 %v2038_v4, %s1950_s29  ;;  %639 = vrot.lane.b32.xlu0 %v2032_v2, %s1949_s28 }
  0x2d   : > { %806 = vrot.lane.b32.xlu1 %v2032_v2, %s1950_s29  ;;  %810 = vrot.lane.b32.xlu0 %v802_v6, %s1950_s29 }
  0x31   : > { %977 = vrot.lane.b32.xlu1 %v969_v7, %s1951_s30  ;;  %975 = vrot.lane.b32.xlu0 %v2038_v4, %s1951_s30 }
  0x35   : > { %1142 = vrot.lane.b32.xlu1 %v2038_v4, %s1952_s3  ;;  %973 = vrot.lane.b32.xlu0 %v2032_v2, %s1951_s30 }
  0x39   : > { %1140 = vrot.lane.b32.xlu1 %v2032_v2, %s1952_s3  ;;  %1144 = vrot.lane.b32.xlu0 %v1136_v8, %s1952_s3 }
  0x3d   : > { %1311 = vrot.lane.b32.xlu1 %v1303_v9, %s1953_s4  ;;  %1309 = vrot.lane.b32.xlu0 %v2038_v4, %s1953_s4 }
  0x41   : > { %1476 = vrot.lane.b32.xlu1 %v2038_v4, %s1954_s5  ;;  %1307 = vrot.lane.b32.xlu0 %v2032_v2, %s1953_s4 }
  0x45   : > { %1474 = vrot.lane.b32.xlu1 %v2032_v2, %s1954_s5  ;;  %1478 = vrot.lane.b32.xlu0 %v1470_v10, %s1954_s5  ;;  %s134_s5 = sand.u32 1, %s1935_s10  }
  0x46   : > { %s1830_s6 = smul.u32 24, %s134_s5  ;;  %s1641_s22 = scalar_lea.sflag [#allocation3], %s134_s5 }
  0x48   : > { %s136_s8 = scalar_lea.vmem [#allocation2], %s1830_s6 }
  0x49   : > { %s1655_s14 = sshll.u32 %s136_s8, 4  ;;  %s1656_s14 = int_to_ptr.vmem [resolvable:$true] %s1655_s14 }
  0x4a   : > { %s1883_s13 = scalar_lea.vmem %s1656_s14, 384  ;;  %p1890_p0 = scmp.lt.s32.totalorder %s1656_s14, %s1888_s24 }
  0x4b   : > { %p1884_p11 = scmp.ne.s32.totalorder %s1656_s14, %s1883_s13  ;;  %p1891_p1 = scmp.lt.s32.totalorder %s1889_s25, %s1883_s13 }
  0x4d   : > { %p1885_p12 = pnand %p1884_p11, %p2009_p5  ;;  %p1892_p2 = por %p1891_p1, %p1890_p0 }
  0x4f   : > { %p1886_p13 = pneg %p1885_p12 }
  0x51   : > { %p1893_p3 = pnand %p1892_p2, %p1886_p13 }
  0x8b   : > { %v161_v12 = vpop.permute.xlu0 %160  ;;  %v157_v13 = vpop.permute.xlu1 %156 }
  0x8c   : > { %1786 = vmatpush3.msk.msra.mxu1 %vm169_vm1, %v161_v12 }
  0x8d   : > { %1788 = vmatmul.mubr.msk.f32.vlgmr.msra.gmra.mxu1 %vm165_vm2, %v143_v11  ;;  %1790 = vmatprep.subr.mxu1 %v1945_v0 }
  0x8e   : > { %1791 = vmatpush3.msk.msra.mxu1 %vm169_vm1, %v152_v1  ;;  %1792 = vmatprep.mubr.msk.f32.mxu1 %vm1946_vm0, %v1945_v0 }
  0x8f   : > { %v477_v15 = vpop.permute.xlu0 %476  ;;  %v473_v16 = vpop.permute.xlu1 %472  ;;  %1795 = vmatprep.subr.mxu1 %v1945_v0 }
  0x91   : > { %1793 = vmatmul.mubr.msk.f32.vlgmr.msra.gmra.mxu1 %vm165_vm2, %v142_v14 }
  0x92   : > { %1796 = vmatpush3.msk.msra.mxu1 %vm169_vm1, %v477_v15  ;;  %1797 = vmatprep.mubr.msk.f32.mxu1 %vm1946_vm0, %v1945_v0 }
  0x93   : > { %v475_v18 = vpop.permute.xlu1 %474  ;;  %v159_v19 = vpop.permute.xlu0 %158  ;;  %1800 = vmatprep.subr.mxu1 %v1945_v0 }
  0x94   : > { %v164_v20 = vsel %vm162_vm3, %v159_v19, %v161_v12  ;;  %v163_v21 = vsel %vm162_vm3, %v157_v13, %v159_v19  ;;  %v480_v25 = vsel %vm478_vm4, %v475_v18, %v477_v15  ;;  %v479_v26 = vsel %vm478_vm4, %v473_v16, %v475_v18 }
  0x95   : > { %1719 = vmatprep.subr.msk.mxu0 %vm169_vm1, %v164_v20  ;;  %1798 = vmatmul.mubr.msk.f32.vlgmr.msra.gmra.mxu1 %vm165_vm2, %v144_v17 }
  0x96   : > { %1720 = vmatpush1.msk.msra.mxu0 %vm169_vm1, %v163_v21  ;;  %1802 = vmatprep.mubr.msk.f32.mxu1 %vm1946_vm0, %v1945_v0 }
  0x97   : > { %v644_v22 = vpop.permute.xlu1 %643  ;;  %1721 = vmatmul.mubr.msk.f32.vlgmr.msra.gmra.mxu0 %vm165_vm2, %v143_v11  ;;  %1724 = vmatprep.subr.msk.mxu0 %vm169_vm1, %v2038_v4  ;;  %v642_v23 = vpop.permute.xlu0 %641 }
  0x98   : > { %1725 = vmatpush1.msk.msra.mxu0 %vm169_vm1, %v2032_v2  ;;  %1801 = vmatpush3.msk.msra.mxu1 %vm169_vm1, %v644_v22  ;;  %v647_v29 = vsel %vm645_vm5, %v642_v23, %v644_v22 }
  0x99   : > { %1729 = vmatprep.subr.msk.mxu0 %vm169_vm1, %v480_v25  ;;  %390 = vmatprep.mubr.f32.mxu0 %v1945_v0 }
  0x9a   : > { %1805 = vmatprep.subr.mxu1 %v1945_v0  ;;  %1803 = vmatmul.mubr.msk.f32.vlgmr.msra.gmra.mxu1 %vm165_vm2, %v145_v24 }
  0x9b   : > { %v809_v27 = vpop.permute.xlu1 %808  ;;  %1726 = vmatmul.mubr.msk.f32.vlgmr.msra.gmra.mxu0 %vm165_vm2, %v142_v14  ;;  %v640_v28 = vpop.permute.xlu0 %639  ;;  %1807 = vmatprep.mubr.msk.f32.mxu1 %vm1946_vm0, %v1945_v0 }
  0x9c   : > { %1730 = vmatpush1.msk.msra.mxu0 %vm169_vm1, %v479_v26  ;;  %554 = vmatprep.mubr.f32.mxu0 %v1945_v0  ;;  %v646_v30 = vsel %vm645_vm5, %v640_v28, %v642_v23 }
  0x9d   : > { %1734 = vmatprep.subr.msk.mxu0 %vm169_vm1, %v647_v29 }
  0x9f   : > { %v807_v31 = vpop.permute.xlu1 %806  ;;  %1731 = vmatmul.mubr.msk.f32.vlgmr.msra.gmra.mxu0 %vm165_vm2, %v144_v17  ;;  %v811_v32 = vpop.permute.xlu0 %810 }
  0xa0   : > { %1735 = vmatpush1.msk.msra.mxu0 %vm169_vm1, %v646_v30  ;;  %v814_v34 = vsel %vm812_vm6, %v809_v27, %v811_v32  ;;  %1806 = vmatpush3.msk.msra.mxu1 %vm169_vm1, %v811_v32  ;;  %v813_v35 = vsel %vm812_vm6, %v807_v31, %v809_v27 }
  0xa1   : > { %1739 = vmatprep.subr.msk.mxu0 %vm169_vm1, %v814_v34  ;;  %721 = vmatprep.mubr.f32.mxu0 %v1945_v0 }
  0xa2   : > { %1808 = vmatmul.mubr.msk.f32.vlgmr.msra.gmra.mxu1 %vm165_vm2, %v146_v33  ;;  %1810 = vmatprep.subr.mxu1 %v1945_v0 }
  0xa3   : > { %v978_v36 = vpop.permute.xlu1 %977  ;;  %1736 = vmatmul.mubr.msk.f32.vlgmr.msra.gmra.mxu0 %vm165_vm2, %v145_v24  ;;  %v976_v37 = vpop.permute.xlu0 %975  ;;  %1812 = vmatprep.mubr.msk.f32.mxu1 %vm1946_vm0, %v1945_v0 }
  0xa4   : > { %1740 = vmatpush1.msk.msra.mxu0 %vm169_vm1, %v813_v35  ;;  %v981_v39 = vsel %vm979_vm7, %v976_v37, %v978_v36  ;;  %1811 = vmatpush3.msk.msra.mxu1 %vm169_vm1, %v978_v36 }
  0xa5   : > { %1744 = vmatprep.subr.msk.mxu0 %vm169_vm1, %v981_v39  ;;  %888 = vmatprep.mubr.f32.mxu0 %v1945_v0 }
  0xa6   : > { %1813 = vmatmul.mubr.msk.f32.vlgmr.msra.gmra.mxu1 %vm165_vm2, %v147_v38  ;;  %1815 = vmatprep.subr.mxu1 %v1945_v0 }
  0xa7   : > { %v1143_v40 = vpop.permute.xlu1 %1142  ;;  %1741 = vmatmul.mubr.msk.f32.vlgmr.msra.gmra.mxu0 %vm165_vm2, %v146_v33  ;;  %v974_v41 = vpop.permute.xlu0 %973  ;;  %1817 = vmatprep.mubr.msk.f32.mxu1 %vm1946_vm0, %v1945_v0 }
  0xa8   : > { %v980_v42 = vsel %vm979_vm7, %v974_v41, %v976_v37  ;;  %1055 = vmatprep.mubr.f32.mxu0 %v1945_v0 }
  0xa9   : > { %1745 = vmatpush1.msk.msra.mxu0 %vm169_vm1, %v980_v42 }
  0xab   : > { %v1141_v44 = vpop.permute.xlu1 %1140  ;;  %1746 = vmatmul.mubr.msk.f32.vlgmr.msra.gmra.mxu0 %vm165_vm2, %v147_v38  ;;  %v1145_v45 = vpop.permute.xlu0 %1144 }
  0xac   : > { %v1147_v46 = vsel %vm1146_vm8, %v1141_v44, %v1143_v40  ;;  %v1148_v47 = vsel %vm1146_vm8, %v1143_v40, %v1145_v45  ;;  %1816 = vmatpush3.msk.msra.mxu1 %vm169_vm1, %v1145_v45  ;;  %1222 = vmatprep.mubr.f32.mxu0 %v1945_v0 }
  0xad   : > { %1749 = vmatprep.subr.msk.mxu0 %vm169_vm1, %v1148_v47  ;;  %1818 = vmatmul.mubr.msk.f32.vlgmr.msra.gmra.mxu1 %vm165_vm2, %v148_v43 }
  0xae   : > { %1750 = vmatpush1.msk.msra.mxu0 %vm169_vm1, %v1147_v46  ;;  %1820 = vmatprep.subr.mxu1 %v1945_v0 }
  0xaf   : > { %v1312_v49 = vpop.permute.xlu1 %1311  ;;  %1751 = vmatmul.mubr.msk.f32.vlgmr.msra.gmra.mxu0 %vm165_vm2, %v148_v43  ;;  %v1310_v50 = vpop.permute.xlu0 %1309  ;;  %1822 = vmatprep.mubr.msk.f32.mxu1 %vm1946_vm0, %v1945_v0 }
  0xb0   : > { %v1315_v51 = vsel %vm1313_vm9, %v1310_v50, %v1312_v49  ;;  %1821 = vmatpush3.msk.msra.mxu1 %vm169_vm1, %v1312_v49  ;;  %1389 = vmatprep.mubr.f32.mxu0 %v1945_v0 }
  0xb1   : > { %1754 = vmatprep.subr.msk.mxu0 %vm169_vm1, %v1315_v51  ;;  %1823 = vmatmul.mubr.msk.f32.vlgmr.msra.gmra.mxu1 %vm165_vm2, %v149_v48 }
  0xb2   : > { %1825 = vmatprep.subr.mxu1 %v1945_v0  ;;  %1827 = vmatprep.mubr.msk.f32.mxu1 %vm1946_vm0, %v1945_v0 }
  0xb3   : > { %v1477_v52 = vpop.permute.xlu1 %1476  ;;  %v1308_v53 = vpop.permute.xlu0 %1307 }
  0xb4   : > { %v1314_v54 = vsel %vm1313_vm9, %v1308_v53, %v1310_v50 }
  0xb5   : > { %1755 = vmatpush1.msk.msra.mxu0 %vm169_vm1, %v1314_v54 }
  0xb6   : > { %1756 = vmatmul.mubr.msk.f32.vlgmr.msra.gmra.mxu0 %vm165_vm2, %v149_v48 }
  0xb7   : > { %v1475_v56 = vpop.permute.xlu1 %1474  ;;  %v1479_v57 = vpop.permute.xlu0 %1478  ;;  %1556 = vmatprep.mubr.f32.mxu0 %v1945_v0 }
  0xb8   : > { %v1481_v58 = vsel %vm1480_vm10, %v1475_v56, %v1477_v52  ;;  %v1482_v59 = vsel %vm1480_vm10, %v1477_v52, %v1479_v57  ;;  %1826 = vmatpush3.msk.msra.mxu1 %vm169_vm1, %v1479_v57 }
  0xb9   : > { %1759 = vmatprep.subr.msk.mxu0 %vm169_vm1, %v1482_v59  ;;  %1828 = vmatmul.mubr.msk.f32.vlgmr.msra.gmra.mxu1 %vm165_vm2, %v150_v55 }
  0xba   : > { %1760 = vmatpush1.msk.msra.mxu0 %vm169_vm1, %v1481_v58 }
  0xbb   : > { %1761 = vmatmul.mubr.msk.f32.vlgmr.msra.gmra.mxu0 %vm165_vm2, %v150_v55 }
 0x14d   : > { %v313_v60 = vpop.f32.mrf.mxu1 }
 0x14f   : > { %v1789_v61 = vpop.f32.mrf.mxu1 }
 0x151   : > { %v463_v62 = vpop.f32.mrf.mxu1 }
 0x152   : > { %v464_v12 = vadd.f32 %v463_v62, %v313_v60 }
 0x153   : > { %v1794_v63 = vpop.f32.mrf.mxu1 }
 0x155   : > { %v627_v1 = vpop.f32.mrf.mxu1 }
 0x156   : > { %v633_v17 = vadd.f32 %v627_v1, %v464_v12 }
 0x157   : > { %v242_v2 = vpop.f32.mrf.mxu0  ;;  %v1799_v3 = vpop.f32.mrf.mxu1 }
 0x159   : > { %v244_v0 = vpop.f32.mrf.mxu0 }
 0x15a   : > { %v794_v4 = vpop.f32.mrf.mxu1 }
 0x15b   : > { %v392_v5 = vpop.f32.mrf.mxu0  ;;  %v800_v21 = vadd.f32 %v794_v4, %v633_v17 }
 0x15c   : > { %v1804_v6 = vpop.f32.mrf.mxu1  ;;  %v393_v24 = vadd.f32 %v392_v5, %v242_v2 }
 0x15d   : > { %v394_v7 = vpop.f32.mrf.mxu0 }
 0x15e   : > { %v395_v26 = vadd.f32 %v394_v7, %v244_v0 }
 0x15f   : > { %v556_v8 = vpop.f32.mrf.mxu0 }
 0x160   : > { %v631_v27 = vadd.f32 %v556_v8, %v393_v24 }
 0x161   : > { %v558_v9 = vpop.f32.mrf.mxu0 }
 0x162   : > { %v961_v10 = vpop.f32.mrf.mxu1  ;;  %v632_v31 = vadd.f32 %v558_v9, %v395_v26 }
 0x163   : > { %v723_v11 = vpop.f32.mrf.mxu0  ;;  %v967_v28 = vadd.f32 %v961_v10, %v800_v21 }
 0x164   : > { %v1809_v13 = vpop.f32.mrf.mxu1  ;;  %v798_v32 = vadd.f32 %v723_v11, %v631_v27 }
 0x165   : > { %v725_v14 = vpop.f32.mrf.mxu0 }
 0x166   : > { %v1128_v15 = vpop.f32.mrf.mxu1  ;;  %v799_v34 = vadd.f32 %v725_v14, %v632_v31 }
 0x167   : > { %v890_v16 = vpop.f32.mrf.mxu0  ;;  %v1134_v36 = vadd.f32 %v1128_v15, %v967_v28 }
 0x168   : > { %v1814_v18 = vpop.f32.mrf.mxu1  ;;  %v965_v35 = vadd.f32 %v890_v16, %v798_v32 }
 0x169   : > { %v892_v19 = vpop.f32.mrf.mxu0 }
 0x16a   : > { %v966_v38 = vadd.f32 %v892_v19, %v799_v34 }
 0x16b   : > { %v1057_v20 = vpop.f32.mrf.mxu0 }
 0x16c   : > { %v1132_v39 = vadd.f32 %v1057_v20, %v965_v35 }
 0x16d   : > { %v1059_v22 = vpop.f32.mrf.mxu0  ;;  %v1295_v23 = vpop.f32.mrf.mxu1 }
 0x16e   : > { %v1301_v40 = vadd.f32 %v1295_v23, %v1134_v36  ;;  %v1133_v42 = vadd.f32 %v1059_v22, %v966_v38 }
 0x16f   : > { %v1819_v25 = vpop.f32.mrf.mxu1  ;;  %v1224_v29 = vpop.f32.mrf.mxu0 }
 0x170   : > { %v1299_v43 = vadd.f32 %v1224_v29, %v1132_v39 }
 0x171   : > { %v1462_v30 = vpop.f32.mrf.mxu1  ;;  %v1226_v37 = vpop.f32.mrf.mxu0 }
 0x172   : > { %v1468_v44 = vadd.f32 %v1462_v30, %v1301_v40  ;;  %v1300_v47 = vadd.f32 %v1226_v37, %v1133_v42 }
 0x173   : > { %v1824_v33 = vpop.f32.mrf.mxu1 }
 0x176   : > { %v1391_v41 = vpop.f32.mrf.mxu0 }
 0x177   : > { %v1466_v48 = vadd.f32 %v1391_v41, %v1299_v43 }
 0x178   : > { %v1393_v45 = vpop.f32.mrf.mxu0 }
 0x179   : > { %v1629_v46 = vpop.f32.mrf.mxu1  ;;  %v1467_v52 = vadd.f32 %v1393_v45, %v1300_v47 }
 0x17a   : > { %v1635_v49 = vadd.f32 %v1629_v46, %v1468_v44 }
 0x17b   : > { %v1558_v50 = vpop.f32.mrf.mxu0  ;;  %v1829_v51 = vpop.f32.mrf.mxu1 }
 0x17c   : > { %1639 = vst.msk [vmem:[%s136_s8 + $0x10] sm:$0xff] %vm1638_vm11, %v1635_v49  ;;  %v1633_v53 = vadd.f32 %v1558_v50, %v1466_v48 }
 0x17d   : > { %v1560_v54 = vpop.f32.mrf.mxu0 }
 0x17e   : > { %1636 = vst [vmem:[%s136_s8] sm:$0xff] %v1633_v53  ;;  %v1634_v55 = vadd.f32 %v1560_v54, %v1467_v52 }
 0x180   : > { %1637 = vst [vmem:[%s136_s8 + $0x8] sm:$0xff] %v1634_v55 }
 0x181   : > { %1896 = shalt.err (!%p1893_p3)
}
 0x182   : > { %s1897_s26 = scalar_lea.hbm %s1653_s21, 384  ;;  %s1901_s29 = scalar_lea.hbm %s2213_s2, 768 }
 0x183   : > { %p1898_p4 = scmp.ne.s32.totalorder %s1653_s21, %s1897_s26  ;;  %p1902_p9 = scmp.lt.s32.totalorder %s1653_s21, %s2213_s2 }
 0x184   : > { %p1903_p10 = scmp.lt.s32.totalorder %s1901_s29, %s1897_s26 }
 0x185   : > { %p1899_p7 = pnand %p1898_p4, %p2009_p5 }
 0x186   : > { %p1904_p11 = por %p1903_p10, %p1902_p9 }
 0x187   : > { %p1900_p8 = pneg %p1899_p7 }
 0x189   : > { %p1905_p12 = pnand %p1904_p11, %p1900_p8 }
 0x18b   : > { %1908 = shalt.err (!%p1905_p12)
}
 0x18c   : > { %1833 = dma.vmem_to_hbm [thread:$0]  (%p2009_p5), %s1656_s14, 384, %s1653_s21, %s1641_s22  }
 0x18d PF: > { %p1839_p13 = scmp.ge.s32.totalorder %s1943_s12, 2  ;;  %s1667_s4 = sand.u32 1, %s1931_s9  }
 0x18e   : > { %s1668_s5 = scalar_lea.sflag [#allocation3], %s1667_s4 }
 0x18f   : > { %p1836_p0 = pnand %p1839_p13, %p2013_p6 }
 0x191   : > { %p1837_p1 = pneg %p1836_p0 }
 0x193   : > { %1926 = dma.done.wait (%p1837_p1), %s1668_s5, 384  }
 0x194   : > { %1928 = vsyncadd (%p1837_p1), %s1668_s5, 4294966912  ;;  %p12_p2 = scmp.ge.s32.totalorder %s1996_s15, 4   ;;  %s2216_s9 = smov %s1935_s10 }
 0x195   : > { %s2217_s10 = smov %s1939_s11  ;;  %s2218_s11 = smov %s2007_s18 }
 0x196   : > { %s2219_s12 = smov %s1996_s15  ;;  %14 = sbr.rel (!%p12_p2) target bundleno = 3 (0x3), region = 63 }
 0x19b   :  { %1673 = vsyncpa [#allocation3], 1 }
 0x19c   :  { %1675 = vsyncpa [#allocation3 + $0x1], 1 }

</bundles_post_ra>
